<compile_context>
chip_gen: v5e
topology: v5e:2x2
jax: 0.10.0
libtpu: 0.0.40
codegen_flags: <defaults>
</compile_context>

<pallas_src>
import functools

import jax
import jax.numpy as jnp
from jax import lax
from jax.experimental import pallas as pl
from jax.experimental.pallas import tpu as pltpu


def mha_kernel(x_ref, wqkv_ref, bqkv_ref, wp_ref, bp_ref, o_ref, *, num_heads):
    """Grid = (B,). One batch element per invocation; all heads handled inline.

    wqkv is pre-arranged (E, 3E) with columns [Q | K | V], each part head-major
    (col = part*E + h*D + d), so a single lane-dense fused matmul produces all
    projections.  The post-softmax 1/sqrt(E) scale is pre-folded into wp.
    """
    x = x_ref[0]                                                    # (N, E)
    N, E = x.shape
    D = E // num_heads

    # Fused Q/K/V projection: one (N, E) @ (E, 3E) MXU pass, 192-lane output.
    qkv = jnp.dot(x, wqkv_ref[...],
                  preferred_element_type=jnp.float32) + bqkv_ref[...]
    q = qkv[:, 0 * E:1 * E]
    k = qkv[:, 1 * E:2 * E]
    v = qkv[:, 2 * E:3 * E]

    heads = []
    for h in range(num_heads):                                      # static unroll
        sl = slice(h * D, (h + 1) * D)
        q_h, k_h, v_h = q[:, sl], k[:, sl], v[:, sl]
        # q_h @ k_h^T without materializing a transposed (D, N) tile.
        energy = lax.dot_general(q_h, k_h, (((1,), (1,)), ((), ())),
                                 preferred_element_type=jnp.float32)  # (N, N)
        # softmax over keys; the /sqrt(E) scale is folded into wp (wrapper).
        e = jnp.exp(energy - jnp.max(energy, axis=-1, keepdims=True))
        inv_denom = pl.reciprocal(jnp.sum(e, axis=-1, keepdims=True),
                                  approx=True)                      # EUP slot
        att = e * inv_denom
        heads.append(jnp.dot(att, v_h,
                             preferred_element_type=jnp.float32))   # (N, D)

    concat = jnp.concatenate(heads, axis=1)                         # (N, E)
    # Single lane-dense output projection; bias fused here -> o_ref written once.
    out = jnp.dot(concat, wp_ref[...],
                  preferred_element_type=jnp.float32) + bp_ref[...]
    o_ref[0] = out.astype(o_ref.dtype)


def multi_head_attention(x, w_qkv, b_qkv, w_proj, b_proj, num_heads):
    """x: (B, N, E). w_qkv: (3E, E) (PyTorch Linear layout), b_qkv: (3E,),
    w_proj: (E, E), b_proj: (E,)."""
    B, N, E = x.shape
    H = num_heads
    D = E // H
    scaling = float(E) ** 0.5

    # PyTorch fused qkv Linear output channel j follows rearrange
    # 'b n (h d qkv) -> qkv b h n d': j = h*(D*3) + d*3 + qkv_idx.
    w_r = w_qkv.reshape(H, D, 3, E)                     # [h, d, part, in]
    b_r = b_qkv.reshape(H, D, 3)
    parts_w = [jnp.transpose(w_r[:, :, p, :], (2, 0, 1)).reshape(E, E)
               for p in range(3)]                       # each (E_in, H*D)
    parts_b = [b_r[:, :, p].reshape(E) for p in range(3)]
    wqkv = jnp.concatenate(parts_w, axis=1)             # (E, 3E): [Q | K | V]
    bqkv = jnp.concatenate(parts_b, axis=0).reshape(1, 3 * E)

    # out = concat_heads @ w_proj.T + b ; fold the post-softmax 1/sqrt(E)
    # scale into the weight (NOT the bias), preserving reference semantics.
    wp = jnp.transpose(w_proj, (1, 0)) / scaling        # (E, E)
    bp = b_proj.reshape(1, E)

    kernel = functools.partial(mha_kernel, num_heads=H)

    return pl.pallas_call(
        kernel,
        out_shape=jax.ShapeDtypeStruct((B, N, E), jnp.float32),
        grid_spec=pltpu.PrefetchScalarGridSpec(
            num_scalar_prefetch=0,
            grid=(B,),
            in_specs=[
                pl.BlockSpec((1, N, E), lambda b: (b, 0, 0)),   # x (per batch)
                pl.BlockSpec((E, 3 * E), lambda b: (0, 0)),     # wqkv (resident)
                pl.BlockSpec((1, 3 * E), lambda b: (0, 0)),     # bqkv (resident)
                pl.BlockSpec((E, E), lambda b: (0, 0)),         # wp   (resident)
                pl.BlockSpec((1, E), lambda b: (0, 0)),         # bp   (resident)
            ],
            out_specs=pl.BlockSpec((1, N, E), lambda b: (b, 0, 0)),
        ),
        compiler_params=pltpu.CompilerParams(
            dimension_semantics=("parallel",)),
    )(x, wqkv, bqkv, wp, bp)


def reference_mha(x, w_qkv, b_qkv, w_proj, b_proj, num_heads):
    """Pure-JAX reference mirroring the PyTorch forward exactly."""
    B, N, E = x.shape
    H = num_heads
    D = E // H
    qkv = x @ w_qkv.T + b_qkv                                  # (B, N, 3E)
    qkv = qkv.reshape(B, N, H, D, 3)
    qkv = jnp.transpose(qkv, (4, 0, 2, 1, 3))                  # (3, B, H, N, D)
    q, k, v = qkv[0], qkv[1], qkv[2]
    energy = jnp.einsum('bhqd,bhkd->bhqk', q, k)
    att = jax.nn.softmax(energy, axis=-1) / (E ** 0.5)
    out = jnp.einsum('bhal,bhlv->bhav', att, v)
    out = jnp.transpose(out, (0, 2, 1, 3)).reshape(B, N, E)
    return out @ w_proj.T + b_proj


if __name__ == "__main__":
    B, N, E, H = 2, 16, 64, 8

    key = jax.random.PRNGKey(0)
    kx, k1, k2, k3, k4 = jax.random.split(key, 5)

    bound = 1.0 / (E ** 0.5)
    x = jax.random.normal(kx, (B, N, E), dtype=jnp.float32)
    w_qkv = jax.random.uniform(k1, (3 * E, E), jnp.float32, -bound, bound)
    b_qkv = jax.random.uniform(k2, (3 * E,), jnp.float32, -bound, bound)
    w_proj = jax.random.uniform(k3, (E, E), jnp.float32, -bound, bound)
    b_proj = jax.random.uniform(k4, (E,), jnp.float32, -bound, bound)

    out = multi_head_attention(x, w_qkv, b_qkv, w_proj, b_proj, H)
    out = jax.block_until_ready(out)

    ref = reference_mha(x, w_qkv, b_qkv, w_proj, b_proj, H)
    assert out.shape == (B, N, E)
    # Tolerance relaxed slightly vs exact f32 because the softmax denominator
    # uses the EUP approximate reciprocal (pl.reciprocal approx=True).
    assert jnp.allclose(out, ref, rtol=5e-3, atol=5e-3), (
        f"max err {jnp.max(jnp.abs(out - ref))}")

    print("KERNEL_OK")
</pallas_src>

<mosaic_0001>
module attributes {stable_mosaic.version = 11 : i64} {
  func.func @mha_kernel(%arg0: i32, %arg1: memref<1x16x64xf32, #tpu.memory_space<vmem>>, %arg2: memref<64x192xf32, #tpu.memory_space<vmem>>, %arg3: memref<1x192xf32, #tpu.memory_space<vmem>>, %arg4: memref<64x64xf32, #tpu.memory_space<vmem>>, %arg5: memref<1x64xf32, #tpu.memory_space<vmem>>, %arg6: memref<1x16x64xf32, #tpu.memory_space<vmem>>) attributes {dimension_semantics = [#tpu.dimension_semantics<parallel>], iteration_bounds = array<i64: 2>, scalar_prefetch = 0 : i64, scratch_operands = 0 : i64, tpu.core_type = #tpu.core_type<tc>, window_params = [{transform_indices = @transform_0, window_bounds = array<i64: 1, 16, 64>}, {pipeline_mode = #tpu.pipeline_mode<synchronous>, transform_indices = @transform_1, window_bounds = array<i64: 64, 192>}, {pipeline_mode = #tpu.pipeline_mode<synchronous>, transform_indices = @transform_2, window_bounds = array<i64: 1, 192>}, {pipeline_mode = #tpu.pipeline_mode<synchronous>, transform_indices = @transform_3, window_bounds = array<i64: 64, 64>}, {pipeline_mode = #tpu.pipeline_mode<synchronous>, transform_indices = @transform_4, window_bounds = array<i64: 1, 64>}, {transform_indices = @transform_5, window_bounds = array<i64: 1, 16, 64>}]} {
    %c0 = arith.constant 0 : index
    %c0_0 = arith.constant 0 : index
    %c0_1 = arith.constant 0 : index
    %0 = vector.load %arg1[%c0, %c0_0, %c0_1] : memref<1x16x64xf32, #tpu.memory_space<vmem>>, vector<1x16x64xf32>
    %1 = vector.shape_cast %0 : vector<1x16x64xf32> to vector<16x64xf32>
    %c0_2 = arith.constant 0 : index
    %c0_3 = arith.constant 0 : index
    %2 = vector.load %arg2[%c0_2, %c0_3] : memref<64x192xf32, #tpu.memory_space<vmem>>, vector<64x192xf32>
    %cst = arith.constant dense<0.000000e+00> : vector<16x192xf32>
    %3 = tpu.matmul %1, %2, %cst {dimension_numbers = #tpu.dot_dimension_numbers<[1], [0], [0], [1], [0, 0, 1, 1], [], []>} : vector<16x64xf32>, vector<64x192xf32>, vector<16x192xf32> -> vector<16x192xf32>
    %c0_4 = arith.constant 0 : index
    %c0_5 = arith.constant 0 : index
    %4 = vector.load %arg3[%c0_4, %c0_5] : memref<1x192xf32, #tpu.memory_space<vmem>>, vector<1x192xf32>
    %5 = vector.broadcast %4 : vector<1x192xf32> to vector<16x192xf32>
    %6 = arith.addf %3, %5 : vector<16x192xf32>
    %7 = vector.extract_strided_slice %6 {offsets = [0, 0], sizes = [16, 64], strides = [1, 1]} : vector<16x192xf32> to vector<16x64xf32>
    %8 = vector.extract_strided_slice %6 {offsets = [0, 64], sizes = [16, 64], strides = [1, 1]} : vector<16x192xf32> to vector<16x64xf32>
    %9 = vector.extract_strided_slice %6 {offsets = [0, 128], sizes = [16, 64], strides = [1, 1]} : vector<16x192xf32> to vector<16x64xf32>
    %10 = vector.extract_strided_slice %7 {offsets = [0, 0], sizes = [16, 8], strides = [1, 1]} : vector<16x64xf32> to vector<16x8xf32>
    %11 = vector.extract_strided_slice %8 {offsets = [0, 0], sizes = [16, 8], strides = [1, 1]} : vector<16x64xf32> to vector<16x8xf32>
    %12 = vector.extract_strided_slice %9 {offsets = [0, 0], sizes = [16, 8], strides = [1, 1]} : vector<16x64xf32> to vector<16x8xf32>
    %cst_6 = arith.constant dense<0.000000e+00> : vector<16x16xf32>
    %13 = tpu.matmul %10, %11, %cst_6 {dimension_numbers = #tpu.dot_dimension_numbers<[1], [1], [0], [0], [0, 0, 1, 0], [], []>} : vector<16x8xf32>, vector<16x8xf32>, vector<16x16xf32> -> vector<16x16xf32>
    %cst_7 = arith.constant dense<0xFF800000> : vector<16xf32>
    %14 = vector.multi_reduction <maximumf>, %13, %cst_7 [1] : vector<16x16xf32> to vector<16xf32>
    %15 = vector.shape_cast %14 : vector<16xf32> to vector<16x1xf32>
    %16 = vector.broadcast %15 : vector<16x1xf32> to vector<16x16xf32>
    %17 = arith.subf %13, %16 : vector<16x16xf32>
    %18 = math.exp %17 : vector<16x16xf32>
    %cst_8 = arith.constant dense<0.000000e+00> : vector<16xf32>
    %19 = vector.multi_reduction <add>, %18, %cst_8 [1] : vector<16x16xf32> to vector<16xf32>
    %20 = vector.shape_cast %19 : vector<16xf32> to vector<16x1xf32>
    %21 = tpu.reciprocal %20 {approx = true} : vector<16x1xf32> -> vector<16x1xf32>
    %22 = vector.broadcast %21 : vector<16x1xf32> to vector<16x16xf32>
    %23 = arith.mulf %18, %22 : vector<16x16xf32>
    %cst_9 = arith.constant dense<0.000000e+00> : vector<16x8xf32>
    %24 = tpu.matmul %23, %12, %cst_9 {dimension_numbers = #tpu.dot_dimension_numbers<[1], [0], [0], [1], [0, 0, 1, 1], [], []>} : vector<16x16xf32>, vector<16x8xf32>, vector<16x8xf32> -> vector<16x8xf32>
    %25 = vector.extract_strided_slice %7 {offsets = [0, 8], sizes = [16, 8], strides = [1, 1]} : vector<16x64xf32> to vector<16x8xf32>
    %26 = vector.extract_strided_slice %8 {offsets = [0, 8], sizes = [16, 8], strides = [1, 1]} : vector<16x64xf32> to vector<16x8xf32>
    %27 = vector.extract_strided_slice %9 {offsets = [0, 8], sizes = [16, 8], strides = [1, 1]} : vector<16x64xf32> to vector<16x8xf32>
    %cst_10 = arith.constant dense<0.000000e+00> : vector<16x16xf32>
    %28 = tpu.matmul %25, %26, %cst_10 {dimension_numbers = #tpu.dot_dimension_numbers<[1], [1], [0], [0], [0, 0, 1, 0], [], []>} : vector<16x8xf32>, vector<16x8xf32>, vector<16x16xf32> -> vector<16x16xf32>
    %cst_11 = arith.constant dense<0xFF800000> : vector<16xf32>
    %29 = vector.multi_reduction <maximumf>, %28, %cst_11 [1] : vector<16x16xf32> to vector<16xf32>
    %30 = vector.shape_cast %29 : vector<16xf32> to vector<16x1xf32>
    %31 = vector.broadcast %30 : vector<16x1xf32> to vector<16x16xf32>
    %32 = arith.subf %28, %31 : vector<16x16xf32>
    %33 = math.exp %32 : vector<16x16xf32>
    %cst_12 = arith.constant dense<0.000000e+00> : vector<16xf32>
    %34 = vector.multi_reduction <add>, %33, %cst_12 [1] : vector<16x16xf32> to vector<16xf32>
    %35 = vector.shape_cast %34 : vector<16xf32> to vector<16x1xf32>
    %36 = tpu.reciprocal %35 {approx = true} : vector<16x1xf32> -> vector<16x1xf32>
    %37 = vector.broadcast %36 : vector<16x1xf32> to vector<16x16xf32>
    %38 = arith.mulf %33, %37 : vector<16x16xf32>
    %cst_13 = arith.constant dense<0.000000e+00> : vector<16x8xf32>
    %39 = tpu.matmul %38, %27, %cst_13 {dimension_numbers = #tpu.dot_dimension_numbers<[1], [0], [0], [1], [0, 0, 1, 1], [], []>} : vector<16x16xf32>, vector<16x8xf32>, vector<16x8xf32> -> vector<16x8xf32>
    %40 = vector.extract_strided_slice %7 {offsets = [0, 16], sizes = [16, 8], strides = [1, 1]} : vector<16x64xf32> to vector<16x8xf32>
    %41 = vector.extract_strided_slice %8 {offsets = [0, 16], sizes = [16, 8], strides = [1, 1]} : vector<16x64xf32> to vector<16x8xf32>
    %42 = vector.extract_strided_slice %9 {offsets = [0, 16], sizes = [16, 8], strides = [1, 1]} : vector<16x64xf32> to vector<16x8xf32>
    %cst_14 = arith.constant dense<0.000000e+00> : vector<16x16xf32>
    %43 = tpu.matmul %40, %41, %cst_14 {dimension_numbers = #tpu.dot_dimension_numbers<[1], [1], [0], [0], [0, 0, 1, 0], [], []>} : vector<16x8xf32>, vector<16x8xf32>, vector<16x16xf32> -> vector<16x16xf32>
    %cst_15 = arith.constant dense<0xFF800000> : vector<16xf32>
    %44 = vector.multi_reduction <maximumf>, %43, %cst_15 [1] : vector<16x16xf32> to vector<16xf32>
    %45 = vector.shape_cast %44 : vector<16xf32> to vector<16x1xf32>
    %46 = vector.broadcast %45 : vector<16x1xf32> to vector<16x16xf32>
    %47 = arith.subf %43, %46 : vector<16x16xf32>
    %48 = math.exp %47 : vector<16x16xf32>
    %cst_16 = arith.constant dense<0.000000e+00> : vector<16xf32>
    %49 = vector.multi_reduction <add>, %48, %cst_16 [1] : vector<16x16xf32> to vector<16xf32>
    %50 = vector.shape_cast %49 : vector<16xf32> to vector<16x1xf32>
    %51 = tpu.reciprocal %50 {approx = true} : vector<16x1xf32> -> vector<16x1xf32>
    %52 = vector.broadcast %51 : vector<16x1xf32> to vector<16x16xf32>
    %53 = arith.mulf %48, %52 : vector<16x16xf32>
    %cst_17 = arith.constant dense<0.000000e+00> : vector<16x8xf32>
    %54 = tpu.matmul %53, %42, %cst_17 {dimension_numbers = #tpu.dot_dimension_numbers<[1], [0], [0], [1], [0, 0, 1, 1], [], []>} : vector<16x16xf32>, vector<16x8xf32>, vector<16x8xf32> -> vector<16x8xf32>
    %55 = vector.extract_strided_slice %7 {offsets = [0, 24], sizes = [16, 8], strides = [1, 1]} : vector<16x64xf32> to vector<16x8xf32>
    %56 = vector.extract_strided_slice %8 {offsets = [0, 24], sizes = [16, 8], strides = [1, 1]} : vector<16x64xf32> to vector<16x8xf32>
    %57 = vector.extract_strided_slice %9 {offsets = [0, 24], sizes = [16, 8], strides = [1, 1]} : vector<16x64xf32> to vector<16x8xf32>
    %cst_18 = arith.constant dense<0.000000e+00> : vector<16x16xf32>
    %58 = tpu.matmul %55, %56, %cst_18 {dimension_numbers = #tpu.dot_dimension_numbers<[1], [1], [0], [0], [0, 0, 1, 0], [], []>} : vector<16x8xf32>, vector<16x8xf32>, vector<16x16xf32> -> vector<16x16xf32>
    %cst_19 = arith.constant dense<0xFF800000> : vector<16xf32>
    %59 = vector.multi_reduction <maximumf>, %58, %cst_19 [1] : vector<16x16xf32> to vector<16xf32>
    %60 = vector.shape_cast %59 : vector<16xf32> to vector<16x1xf32>
    %61 = vector.broadcast %60 : vector<16x1xf32> to vector<16x16xf32>
    %62 = arith.subf %58, %61 : vector<16x16xf32>
    %63 = math.exp %62 : vector<16x16xf32>
    %cst_20 = arith.constant dense<0.000000e+00> : vector<16xf32>
    %64 = vector.multi_reduction <add>, %63, %cst_20 [1] : vector<16x16xf32> to vector<16xf32>
    %65 = vector.shape_cast %64 : vector<16xf32> to vector<16x1xf32>
    %66 = tpu.reciprocal %65 {approx = true} : vector<16x1xf32> -> vector<16x1xf32>
    %67 = vector.broadcast %66 : vector<16x1xf32> to vector<16x16xf32>
    %68 = arith.mulf %63, %67 : vector<16x16xf32>
    %cst_21 = arith.constant dense<0.000000e+00> : vector<16x8xf32>
    %69 = tpu.matmul %68, %57, %cst_21 {dimension_numbers = #tpu.dot_dimension_numbers<[1], [0], [0], [1], [0, 0, 1, 1], [], []>} : vector<16x16xf32>, vector<16x8xf32>, vector<16x8xf32> -> vector<16x8xf32>
    %70 = vector.extract_strided_slice %7 {offsets = [0, 32], sizes = [16, 8], strides = [1, 1]} : vector<16x64xf32> to vector<16x8xf32>
    %71 = vector.extract_strided_slice %8 {offsets = [0, 32], sizes = [16, 8], strides = [1, 1]} : vector<16x64xf32> to vector<16x8xf32>
    %72 = vector.extract_strided_slice %9 {offsets = [0, 32], sizes = [16, 8], strides = [1, 1]} : vector<16x64xf32> to vector<16x8xf32>
    %cst_22 = arith.constant dense<0.000000e+00> : vector<16x16xf32>
    %73 = tpu.matmul %70, %71, %cst_22 {dimension_numbers = #tpu.dot_dimension_numbers<[1], [1], [0], [0], [0, 0, 1, 0], [], []>} : vector<16x8xf32>, vector<16x8xf32>, vector<16x16xf32> -> vector<16x16xf32>
    %cst_23 = arith.constant dense<0xFF800000> : vector<16xf32>
    %74 = vector.multi_reduction <maximumf>, %73, %cst_23 [1] : vector<16x16xf32> to vector<16xf32>
    %75 = vector.shape_cast %74 : vector<16xf32> to vector<16x1xf32>
    %76 = vector.broadcast %75 : vector<16x1xf32> to vector<16x16xf32>
    %77 = arith.subf %73, %76 : vector<16x16xf32>
    %78 = math.exp %77 : vector<16x16xf32>
    %cst_24 = arith.constant dense<0.000000e+00> : vector<16xf32>
    %79 = vector.multi_reduction <add>, %78, %cst_24 [1] : vector<16x16xf32> to vector<16xf32>
    %80 = vector.shape_cast %79 : vector<16xf32> to vector<16x1xf32>
    %81 = tpu.reciprocal %80 {approx = true} : vector<16x1xf32> -> vector<16x1xf32>
    %82 = vector.broadcast %81 : vector<16x1xf32> to vector<16x16xf32>
    %83 = arith.mulf %78, %82 : vector<16x16xf32>
    %cst_25 = arith.constant dense<0.000000e+00> : vector<16x8xf32>
    %84 = tpu.matmul %83, %72, %cst_25 {dimension_numbers = #tpu.dot_dimension_numbers<[1], [0], [0], [1], [0, 0, 1, 1], [], []>} : vector<16x16xf32>, vector<16x8xf32>, vector<16x8xf32> -> vector<16x8xf32>
    %85 = vector.extract_strided_slice %7 {offsets = [0, 40], sizes = [16, 8], strides = [1, 1]} : vector<16x64xf32> to vector<16x8xf32>
    %86 = vector.extract_strided_slice %8 {offsets = [0, 40], sizes = [16, 8], strides = [1, 1]} : vector<16x64xf32> to vector<16x8xf32>
    %87 = vector.extract_strided_slice %9 {offsets = [0, 40], sizes = [16, 8], strides = [1, 1]} : vector<16x64xf32> to vector<16x8xf32>
    %cst_26 = arith.constant dense<0.000000e+00> : vector<16x16xf32>
    %88 = tpu.matmul %85, %86, %cst_26 {dimension_numbers = #tpu.dot_dimension_numbers<[1], [1], [0], [0], [0, 0, 1, 0], [], []>} : vector<16x8xf32>, vector<16x8xf32>, vector<16x16xf32> -> vector<16x16xf32>
    %cst_27 = arith.constant dense<0xFF800000> : vector<16xf32>
    %89 = vector.multi_reduction <maximumf>, %88, %cst_27 [1] : vector<16x16xf32> to vector<16xf32>
    %90 = vector.shape_cast %89 : vector<16xf32> to vector<16x1xf32>
    %91 = vector.broadcast %90 : vector<16x1xf32> to vector<16x16xf32>
    %92 = arith.subf %88, %91 : vector<16x16xf32>
    %93 = math.exp %92 : vector<16x16xf32>
    %cst_28 = arith.constant dense<0.000000e+00> : vector<16xf32>
    %94 = vector.multi_reduction <add>, %93, %cst_28 [1] : vector<16x16xf32> to vector<16xf32>
    %95 = vector.shape_cast %94 : vector<16xf32> to vector<16x1xf32>
    %96 = tpu.reciprocal %95 {approx = true} : vector<16x1xf32> -> vector<16x1xf32>
    %97 = vector.broadcast %96 : vector<16x1xf32> to vector<16x16xf32>
    %98 = arith.mulf %93, %97 : vector<16x16xf32>
    %cst_29 = arith.constant dense<0.000000e+00> : vector<16x8xf32>
    %99 = tpu.matmul %98, %87, %cst_29 {dimension_numbers = #tpu.dot_dimension_numbers<[1], [0], [0], [1], [0, 0, 1, 1], [], []>} : vector<16x16xf32>, vector<16x8xf32>, vector<16x8xf32> -> vector<16x8xf32>
    %100 = vector.extract_strided_slice %7 {offsets = [0, 48], sizes = [16, 8], strides = [1, 1]} : vector<16x64xf32> to vector<16x8xf32>
    %101 = vector.extract_strided_slice %8 {offsets = [0, 48], sizes = [16, 8], strides = [1, 1]} : vector<16x64xf32> to vector<16x8xf32>
    %102 = vector.extract_strided_slice %9 {offsets = [0, 48], sizes = [16, 8], strides = [1, 1]} : vector<16x64xf32> to vector<16x8xf32>
    %cst_30 = arith.constant dense<0.000000e+00> : vector<16x16xf32>
    %103 = tpu.matmul %100, %101, %cst_30 {dimension_numbers = #tpu.dot_dimension_numbers<[1], [1], [0], [0], [0, 0, 1, 0], [], []>} : vector<16x8xf32>, vector<16x8xf32>, vector<16x16xf32> -> vector<16x16xf32>
    %cst_31 = arith.constant dense<0xFF800000> : vector<16xf32>
    %104 = vector.multi_reduction <maximumf>, %103, %cst_31 [1] : vector<16x16xf32> to vector<16xf32>
    %105 = vector.shape_cast %104 : vector<16xf32> to vector<16x1xf32>
    %106 = vector.broadcast %105 : vector<16x1xf32> to vector<16x16xf32>
    %107 = arith.subf %103, %106 : vector<16x16xf32>
    %108 = math.exp %107 : vector<16x16xf32>
    %cst_32 = arith.constant dense<0.000000e+00> : vector<16xf32>
    %109 = vector.multi_reduction <add>, %108, %cst_32 [1] : vector<16x16xf32> to vector<16xf32>
    %110 = vector.shape_cast %109 : vector<16xf32> to vector<16x1xf32>
    %111 = tpu.reciprocal %110 {approx = true} : vector<16x1xf32> -> vector<16x1xf32>
    %112 = vector.broadcast %111 : vector<16x1xf32> to vector<16x16xf32>
    %113 = arith.mulf %108, %112 : vector<16x16xf32>
    %cst_33 = arith.constant dense<0.000000e+00> : vector<16x8xf32>
    %114 = tpu.matmul %113, %102, %cst_33 {dimension_numbers = #tpu.dot_dimension_numbers<[1], [0], [0], [1], [0, 0, 1, 1], [], []>} : vector<16x16xf32>, vector<16x8xf32>, vector<16x8xf32> -> vector<16x8xf32>
    %115 = vector.extract_strided_slice %7 {offsets = [0, 56], sizes = [16, 8], strides = [1, 1]} : vector<16x64xf32> to vector<16x8xf32>
    %116 = vector.extract_strided_slice %8 {offsets = [0, 56], sizes = [16, 8], strides = [1, 1]} : vector<16x64xf32> to vector<16x8xf32>
    %117 = vector.extract_strided_slice %9 {offsets = [0, 56], sizes = [16, 8], strides = [1, 1]} : vector<16x64xf32> to vector<16x8xf32>
    %cst_34 = arith.constant dense<0.000000e+00> : vector<16x16xf32>
    %118 = tpu.matmul %115, %116, %cst_34 {dimension_numbers = #tpu.dot_dimension_numbers<[1], [1], [0], [0], [0, 0, 1, 0], [], []>} : vector<16x8xf32>, vector<16x8xf32>, vector<16x16xf32> -> vector<16x16xf32>
    %cst_35 = arith.constant dense<0xFF800000> : vector<16xf32>
    %119 = vector.multi_reduction <maximumf>, %118, %cst_35 [1] : vector<16x16xf32> to vector<16xf32>
    %120 = vector.shape_cast %119 : vector<16xf32> to vector<16x1xf32>
    %121 = vector.broadcast %120 : vector<16x1xf32> to vector<16x16xf32>
    %122 = arith.subf %118, %121 : vector<16x16xf32>
    %123 = math.exp %122 : vector<16x16xf32>
    %cst_36 = arith.constant dense<0.000000e+00> : vector<16xf32>
    %124 = vector.multi_reduction <add>, %123, %cst_36 [1] : vector<16x16xf32> to vector<16xf32>
    %125 = vector.shape_cast %124 : vector<16xf32> to vector<16x1xf32>
    %126 = tpu.reciprocal %125 {approx = true} : vector<16x1xf32> -> vector<16x1xf32>
    %127 = vector.broadcast %126 : vector<16x1xf32> to vector<16x16xf32>
    %128 = arith.mulf %123, %127 : vector<16x16xf32>
    %cst_37 = arith.constant dense<0.000000e+00> : vector<16x8xf32>
    %129 = tpu.matmul %128, %117, %cst_37 {dimension_numbers = #tpu.dot_dimension_numbers<[1], [0], [0], [1], [0, 0, 1, 1], [], []>} : vector<16x16xf32>, vector<16x8xf32>, vector<16x8xf32> -> vector<16x8xf32>
    %130 = tpu.concatenate %24, %39, %54, %69, %84, %99, %114, %129 in 1 : vector<16x8xf32>, vector<16x8xf32>, vector<16x8xf32>, vector<16x8xf32>, vector<16x8xf32>, vector<16x8xf32>, vector<16x8xf32>, vector<16x8xf32> -> vector<16x64xf32>
    %c0_38 = arith.constant 0 : index
    %c0_39 = arith.constant 0 : index
    %131 = vector.load %arg4[%c0_38, %c0_39] : memref<64x64xf32, #tpu.memory_space<vmem>>, vector<64x64xf32>
    %cst_40 = arith.constant dense<0.000000e+00> : vector<16x64xf32>
    %132 = tpu.matmul %130, %131, %cst_40 {dimension_numbers = #tpu.dot_dimension_numbers<[1], [0], [0], [1], [0, 0, 1, 1], [], []>} : vector<16x64xf32>, vector<64x64xf32>, vector<16x64xf32> -> vector<16x64xf32>
    %c0_41 = arith.constant 0 : index
    %c0_42 = arith.constant 0 : index
    %133 = vector.load %arg5[%c0_41, %c0_42] : memref<1x64xf32, #tpu.memory_space<vmem>>, vector<1x64xf32>
    %134 = vector.broadcast %133 : vector<1x64xf32> to vector<16x64xf32>
    %135 = arith.addf %132, %134 : vector<16x64xf32>
    %c0_43 = arith.constant 0 : index
    %c0_44 = arith.constant 0 : index
    %c0_45 = arith.constant 0 : index
    %136 = vector.load %arg6[%c0_43, %c0_44, %c0_45] : memref<1x16x64xf32, #tpu.memory_space<vmem>>, vector<1x16x64xf32>
    %137 = vector.shape_cast %136 : vector<1x16x64xf32> to vector<16x64xf32>
    %138 = vector.shape_cast %135 : vector<16x64xf32> to vector<1x16x64xf32>
    tpu.vector_store %arg6[%c0_43, %c0_44, %c0_45], %138 {strides = array<i32>} : memref<1x16x64xf32, #tpu.memory_space<vmem>>, vector<1x16x64xf32>,
    return
  }
  func.func @transform_0(%arg0: i32) -> (i32, i32, i32) {
    %c0_i32 = arith.constant 0 : i32
    %c0_i32_0 = arith.constant 0 : i32
    %c0_i32_1 = arith.constant 0 : i32
    return %arg0, %c0_i32, %c0_i32_0 : i32, i32, i32
  }
  func.func @transform_1(%arg0: i32) -> (i32, i32) {
    %c0_i32 = arith.constant 0 : i32
    %c0_i32_0 = arith.constant 0 : i32
    %c0_i32_1 = arith.constant 0 : i32
    return %c0_i32, %c0_i32_0 : i32, i32
  }
  func.func @transform_2(%arg0: i32) -> (i32, i32) {
    %c0_i32 = arith.constant 0 : i32
    %c0_i32_0 = arith.constant 0 : i32
    %c0_i32_1 = arith.constant 0 : i32
    return %c0_i32, %c0_i32_0 : i32, i32
  }
  func.func @transform_3(%arg0: i32) -> (i32, i32) {
    %c0_i32 = arith.constant 0 : i32
    %c0_i32_0 = arith.constant 0 : i32
    %c0_i32_1 = arith.constant 0 : i32
    return %c0_i32, %c0_i32_0 : i32, i32
  }
  func.func @transform_4(%arg0: i32) -> (i32, i32) {
    %c0_i32 = arith.constant 0 : i32
    %c0_i32_0 = arith.constant 0 : i32
    %c0_i32_1 = arith.constant 0 : i32
    return %c0_i32, %c0_i32_0 : i32, i32
  }
  func.func @transform_5(%arg0: i32) -> (i32, i32, i32) {
    %c0_i32 = arith.constant 0 : i32
    %c0_i32_0 = arith.constant 0 : i32
    %c0_i32_1 = arith.constant 0 : i32
    return %arg0, %c0_i32, %c0_i32_0 : i32, i32, i32
  }
}

</mosaic_0001>

<bundles_post_ra>
// kernel: tpu_custom_call.1
= control target key start
LH: loop header
LB: loop body
LE: loop exit
PB: predicated region body
PF: predicated region fallthrough
CT: control target
= control target key end

     0   :  { %10 = vsyncpa [#allocation3], 0  ;;  %s2379_s0 = inlined_call_operand.hbm [shape: f32[2,16,64], index: 0, kind: input, shape index: {}]   ;;  %s2380_s1 = inlined_call_operand.hbm [shape: f32[64,192], index: 1, kind: input, shape index: {}]   ;;  %s2381_s2 = inlined_call_operand.hbm [shape: f32[1,192], index: 2, kind: input, shape index: {}]   ;;  %s2382_s3 = inlined_call_operand.hbm [shape: f32[64,64], index: 3, kind: input, shape index: {}]   ;;  %s2383_s4 = inlined_call_operand.vmem [shape: f32[1,64], index: 4, kind: input, shape index: {}]   ;;  %s2384_s5 = inlined_call_operand.hbm [shape: f32[2,16,64], index: 5, kind: output, shape index: {}]  }
   0x1   :  { %12 = vsyncpa [#allocation3 + $0x1], 0 }
   0x2   :  { %13 = vsyncpa [#allocation6], 0 }
   0x3   :  { %14 = vsyncpa [#allocation9], 0 }
   0x4   :  { %15 = vsyncpa [#allocation4], 0 }
   0x5   :  { %17 = vsyncpa [#allocation4 + $0x1], 0  ;;  %s1894_s18 = smov 0   ;;  %s1896_s19 = smov 0  }
   0x6   :  { %s1898_s20 = smov 0   ;;  %s1900_s21 = smov 0  }
   0x7 LB: > { %s1915_s22 = sadd.s32 4294967295, %s1839_s21   ;;  %s1370_s23 = sadd.s32 4294967294, %s1839_s21   ;;  %s1839_s21 = sphi %s1900_s21, %s2397_s21   ;;  %s1835_s20 = sphi %s1898_s20, %s2396_s20   ;;  %s1831_s19 = sphi %s1896_s19, %s2395_s19   ;;  %s1827_s18 = sphi %s1894_s18, %s2394_s18  }
   0x8   : > { %p43_p0 = scmp.ne.s32.totalorder %s1831_s19, %s1827_s18  ;;  %p44_p1 = scmp.eq.s32.totalorder %s1915_s22, 0 }
   0x9   : > { %p151_p2 = scmp.eq.s32.totalorder %s1915_s22, 1  ;;  %p157_p3 = scmp.eq.s32.totalorder %s1370_s23, 1 }
   0xa   : > { %p1924_p4 = por %p44_p1, %p43_p0  ;;  %p1371_p5 = scmp.ge.s32.totalorder %s1839_s21, 1 }
   0xb   : > { %p1929_p6 = por %p157_p3, %p43_p0  ;;  %p164_p7 = scmp.lt.s32.totalorder %s1839_s21, 3 }
   0xc   : > { %s175_s28 = sshll.u32 %s2380_s1, 4  ;;  %s1841_s30 = smov [#allocation5]   ;;  %s176_s28 = int_to_ptr.hbm [resolvable:$true] %s175_s28 }
   0xd   : > { %p1937_p8 = pnand %p1371_p5, %p164_p7  ;;  %s177_s6 = sshll.u32 %s1841_s30, 4  ;;  %s178_s6 = int_to_ptr.vmem [resolvable:$true] %s177_s6 }
   0xe   : > { %s190_s10 = sshll.u32 %s2381_s2, 4  ;;  %s1842_s11 = smov 256   ;;  %s191_s10 = int_to_ptr.hbm [resolvable:$true] %s190_s10 }
   0xf   : > { %p1464_p9 = pneg %p1937_p8  ;;  %s1843_s12 = smov 16  }
  0x10   : > { %s1844_s13 = smov [#allocation7]   ;;  %s201_s17 = sshll.u32 %s2382_s3, 4  ;;  %s202_s17 = int_to_ptr.hbm [resolvable:$true] %s201_s17 }
  0x11   : > { %p1945_p10 = pnand %p1464_p9, %p44_p1  ;;  %s192_s14 = sshll.u32 %s1844_s13, 4  ;;  %s193_s14 = int_to_ptr.vmem [resolvable:$true] %s192_s14 }
  0x12   : > { %s1845_s23 = smov [#allocation8]   ;;  %s2385_s27 = smov 128  }
  0x13   : > { %1467 = dma.hbm_to_vmem [thread:$0]  (!%p1945_p10), %s176_s28, 2048, %s178_s6, [#allocation6], %s1842_s11, %s1842_s11, %s1843_s12  }
  0x14   : > { %1470 = dma.hbm_to_vmem [thread:$0]  (!%p1945_p10), %s191_s10, 32, %s193_s14, [#allocation6]  }
  0x15   : > { %s203_s26 = sshll.u32 %s1845_s23, 4  ;;  %s1847_s28 = smov 8   ;;  %s204_s26 = int_to_ptr.vmem [resolvable:$true] %s203_s26 }
  0x16   : > { %1473 = dma.hbm_to_vmem [thread:$0]  (!%p1945_p10), %s202_s17, 1024, %s204_s26, [#allocation9], %s2385_s27, %s2385_s27, %s1847_s28  }
  0x17   : > { %s1966_s30 = sadd.s32 1, %s1839_s21   ;;  %s30_s8 = sadd.s32 1, %s1835_s20 }
  0x18   : > { %s27_s6 = ssub.s32 %s1839_s21, %s1966_s30  ;;  %p37_p13 = scmp.ne.s32.totalorder %s1835_s20, %s1831_s19 }
  0x19   : > { %p28_p12 = scmp.eq.s32.totalorder %s27_s6, 0  ;;  %p38_p0 = scmp.eq.s32.totalorder %s1839_s21, 0 }
  0x1a   : > { %p1979_p3 = por %p151_p2, %p37_p13  ;;  %p1485_p5 = scmp.lt.s32.totalorder %s1839_s21, 2 }
  0x1b   : > { %s1975_s9 = scalar_select %p28_p12, %s1835_s20, %s30_s8  }
  0x1c   : > { %s220_s7 = sand.u32 1, %s1835_s20   ;;  %s1444_s11 = sshll.u32 %s1839_s21, 4 }
  0x1d   : > { %p39_p7 = por %p38_p0, %p37_p13  ;;  %s1376_s12 = sshll.u32 %s220_s7, 4 }
  0x1e   : > { %s229_s15 = scalar_lea.hbm %s2379_s0, %s1444_s11  ;;  %s224_s17 = scalar_lea.vmem [#allocation2], %s1376_s12 }
  0x1f   : > { %s230_s16 = sshll.u32 %s229_s15, 4  ;;  %s232_s23 = sshll.u32 %s224_s17, 4  ;;  %s231_s16 = int_to_ptr.hbm [resolvable:$true] %s230_s16  ;;  %s233_s23 = int_to_ptr.vmem [resolvable:$true] %s232_s23 }
  0x20   : > { %p1989_p9 = pnand %p1485_p5, %p39_p7  ;;  %s221_s6 = scalar_lea.sflag [#allocation3], %s220_s7 }
  0x21   : > { %s1735_s8 = sshra.s32 %s231_s16, 4  ;;  %s1742_s12 = scalar_lea.hbm %s2379_s0, 32  ;;  %s1736_s8 = int_to_ptr.hbm [resolvable:$true] %s1735_s8 }
  0x22   : > { %s1737_s27 = scalar_lea.hbm %s1736_s8, 16  ;;  %p1739_p10 = pneg %p1989_p9 }
  0x23   : > { %p1738_p2 = scmp.ne.s32.totalorder %s1736_s8, %s1737_s27  ;;  %p1743_p0 = scmp.lt.s32.totalorder %s1736_s8, %s2379_s0 }
  0x24   : > { %p1744_p5 = scmp.lt.s32.totalorder %s1742_s12, %s1737_s27 }
  0x25   : > { %p1740_p12 = pnand %p1739_p10, %p1738_p2 }
  0x26   : > { %p1745_p7 = por %p1744_p5, %p1743_p0 }
  0x27   : > { %p1741_p13 = pneg %p1740_p12 }
  0x29   : > { %p1746_p11 = pnand %p1745_p7, %p1741_p13 }
  0x2b   : > { %1749 = shalt.err (!%p1746_p11)
}
  0x2c   : > { %s2392_s7 = smov 128   ;;  %244 = sbr.rel (%p1937_p8) target bundleno = 1738 (0x6ca), region = 40 }
  0x2d   : > { %1477 = dma.hbm_to_vmem [thread:$0]  (!%p1989_p9), %s231_s16, 256, %s233_s23, %s221_s6, %s2392_s7, %s2392_s7, %s1847_s28  }
  0x2e   : > { %s2009_s17 = sand.u32 (!%p1937_p8), 1, %s1831_s19  }
  0x2f   : > { %s1380_s27 = sshll.u32 (!%p1937_p8), %s2009_s17, 4  ;;  %s247_s8 = scalar_lea.sflag (!%p1937_p8), [#allocation3], %s2009_s17 }
  0x30   : > { %s2015_s11 = scalar_lea.vmem (!%p1937_p8), [#allocation2], %s1380_s27 }
  0x31   : > { %1810 = dma.done.wait (%p1924_p4), %s247_s8, 256  }
  0x32   : > { %1812 = vsyncadd (%p1924_p4), %s247_s8, 4294967040 }
  0x33   : > { %1814 = dma.done.wait (%p44_p1), [#allocation6], 2080  }
  0x34   : > { %1816 = vsyncadd (%p44_p1), [#allocation6], 4294965216 }
  0x35   : > { %1818 = dma.done.wait (%p44_p1), [#allocation9], 1024  }
  0x36   : > { %1820 = vsyncadd (%p44_p1), [#allocation9], 4294966272  ;;  %v309_v0 = vld [vmem:[#allocation5 + $0x70] sm:$0xff]  ;;  %v307_v1 = vld [vmem:[#allocation5 + $0x60] sm:$0xff]  ;;  %vm317_vm0 = vcmask 523264   ;;  %s1848_s24 = smov 120  }
  0x37   : > { %332 = vmatpush.msra.mxu0 %v309_v0  ;;  %v305_v2 = vld [vmem:[#allocation5 + $0x50] sm:$0xff]  ;;  %v310_v3 = vld [vmem:[#allocation5 + $0x78] sm:$0xff]  ;;  %v308_v4 = vld [vmem:[#allocation5 + $0x68] sm:$0xff]  ;;  %s1849_s29 = smov 64   ;;  %s1850_s28 = smov 104   ;;  %vm376_vm1 = vcmask 64512  }
  0x38   : > { %v303_v5 = vld [vmem:[#allocation5 + $0x40] sm:$0xff]  ;;  %355 = vmatpush.msra.mxu1 %v310_v3  ;;  %v306_v6 = vld [vmem:[#allocation5 + $0x58] sm:$0xff]  ;;  %v301_v7 = vld [vmem:[#allocation5 + $0x30] sm:$0xff]  ;;  %s1851_s16 = smov 56   ;;  %s1852_s23 = smov 40   ;;  %vm408_vm2 = vcmask 130048  }
  0x39   : > { %333 = vmatpush.msra.mxu0 %v307_v1  ;;  %v304_v8 = vld [vmem:[#allocation5 + $0x48] sm:$0xff]  ;;  %v299_v9 = vld [vmem:[#allocation5 + $0x20] sm:$0xff]  ;;  %v302_v10 = vld [vmem:[#allocation5 + $0x38] sm:$0xff]  ;;  %s1853_s26 = smov 48   ;;  %s1854_s6 = smov 112   ;;  %vm1194_vm3 = vcmask 195584  }
  0x3a   : > { %356 = vmatpush.msra.mxu1 %v308_v4  ;;  %v297_v11 = vld [vmem:[#allocation5 + $0x10] sm:$0xff]  ;;  %v300_v12 = vld [vmem:[#allocation5 + $0x28] sm:$0xff]  ;;  %v295_v13 = vld [vmem:[#allocation5] sm:$0xff]  ;;  %s1855_s13 = smov 88   ;;  %s1856_s12 = smov 8   ;;  %vm1197_vm4 = vcmask 261120  }
  0x3b   : > { %334 = vmatpush.msra.mxu0 %v305_v2  ;;  %v293_v14 = vld [vmem:[%s2015_s11] sm:$0xff]  ;;  %v294_v15 = vld [vmem:[%s2015_s11 + $0x8] sm:$0xff]  ;;  %s1857_s14 = smov 16   ;;  %s1858_s15 = smov 80   ;;  %vm1200_vm5 = vcmask 326656   ;;  %vm1203_vm6 = vcmask 392192  }
  0x3c   : > { %357 = vmatpush.msra.mxu1 %v306_v6  ;;  %v298_v16 = vld [vmem:[#allocation5 + $0x18] sm:$0xff]  ;;  %v296_v17 = vld [vmem:[#allocation5 + $0x8] sm:$0xff]  ;;  %v311_v18 = vld [vmem:[#allocation7] sm:$0x3]  ;;  %s1859_s7 = smov 24   ;;  %s1860_s8 = smov 32  }
  0x3d   : > { %335 = vmatpush.msra.mxu0 %v303_v5  ;;  %v313_v19 = vperm.slane %v311_v18, 0  ;;  %v314_v25 = vperm.slane %v311_v18, 1  ;;  %s1861_s11 = smov 96   ;;  %vm1206_vm7 = vcmask 457728  }
  0x3e   : > { %358 = vmatpush.msra.mxu1 %v304_v8 }
  0x3f   : > { %336 = vmatpush.msra.mxu0 %v301_v7 }
  0x40   : > { %359 = vmatpush.msra.mxu1 %v302_v10 }
  0x41   : > { %337 = vmatpush.msra.mxu0 %v299_v9 }
  0x42   : > { %360 = vmatpush.msra.mxu1 %v300_v12 }
  0x43   : > { %338 = vmatpush.msra.mxu0 %v297_v11 }
  0x44   : > { %361 = vmatpush.msra.mxu1 %v298_v16 }
  0x45   : > { %339 = vmatpush.msra.mxu0 %v295_v13 }
  0x46   : > { %1385 = vmatmul.msk.f32.vlgmr.msra.gmra.mxu0 %vm317_vm0, %v293_v14  ;;  %362 = vmatpush.msra.mxu1 %v296_v17 }
  0x47   : > { %1387 = vmatmul.msk.f32.vlgmr.msra.gmra.mxu1 %vm317_vm0, %v293_v14 }
  0x4e   : > { %1386 = vmatmul.msk.f32.gmra.mxu0 %vm317_vm0, %v294_v15 }
  0x4f   : > { %1388 = vmatmul.msk.f32.gmra.mxu1 %vm317_vm0, %v294_v15 }
  0xc3   : > { %v341_v20 = vpop.f32.mrf.mxu0 }
  0xc4   : > { %v2035_v21 = vadd.f32 %v341_v20, %v313_v19  ;;  %v364_v24 = vpop.f32.mrf.mxu1 }
  0xc5   : > { %v2065_v27 = vadd.f32 %v364_v24, %v314_v25 }
  0xc6   : > { %460 = vrot.lane.b32.xlu2 %v2035_v21, %s1848_s24 }
  0xcb   : > { %v344_v22 = vpop.f32.mrf.mxu0 }
  0xcc   : > { %v2039_v23 = vadd.f32 %v344_v22, %v313_v19  ;;  %v367_v26 = vpop.f32.mrf.mxu1 }
  0xcd   : > { %v2067_v28 = vadd.f32 %v367_v26, %v314_v25 }
  0xce   : > { %374 = vrot.lane.b32.xlu0 %v2039_v23, %s1849_s29  ;;  %654 = vrot.lane.b32.xlu2 %v2035_v21, %s1850_s28 }
  0xcf   : > { %451 = vmatpush.msra.mxu3 %v2067_v28  ;;  %v2145_v17 = vpack.i.bf16 %v2065_v27, %v2067_v28 }
  0xd1   : > { %452 = vmatpush.msra.mxu3 %v2065_v27 }
  0xd6   : > { %372 = vrot.lane.b32.xlu0 %v2035_v21, %s1849_s29  ;;  %s1862_s29 = smov 72  }
  0xde   : > { %466 = vrot.lane.b32.xlu0 %v2039_v23, %s1851_s16 }
  0xe6   : > { %462 = vrot.lane.b32.xlu0 %v2039_v23, %s1848_s24 }
  0xee   : > { %660 = vrot.lane.b32.xlu0 %v2039_v23, %s1852_s23 }
  0xf6   : > { %658 = vrot.lane.b32.xlu0 %v2035_v21, %s1852_s23 }
  0xfe   : > { %562 = vrot.lane.b32.xlu0 %v2035_v21, %s1853_s26 }
 0x106   : > { %558 = vrot.lane.b32.xlu0 %v2035_v21, %s1854_s6 }
 0x10e   : > { %560 = vrot.lane.b32.xlu0 %v2039_v23, %s1854_s6 }
 0x116   : > { %848 = vrot.lane.b32.xlu0 %v2039_v23, %s1855_s13 }
 0x11e   : > { %1042 = vrot.lane.b32.xlu0 %v2035_v21, %s1856_s12 }
 0x120   : > { %v461_v54 = vpop.permute.xlu2 %460 }
 0x126   : > { %948 = vrot.lane.b32.xlu0 %v2039_v23, %s1857_s14 }
 0x128   : > { %v655_v55 = vpop.permute.xlu2 %654 }
 0x12e   : > { %942 = vrot.lane.b32.xlu0 %v2035_v21, %s1858_s15 }
 0x140   : > { %v375_v29 = vpop.permute.xlu0 %374 }
 0x141   : > { %1389 = vmatpush.xpose.msk.msra.mxu2 %vm376_vm1, %v375_v29 }
 0x148   : > { %v373_v30 = vpop.permute.xlu0 %372 }
 0x149   : > { %1390 = vmatpush.xpose.msk.msra.mxu2 %vm376_vm1, %v373_v30 }
 0x14c   : > { %1391 = vmatmul.msk.f32.vlgmr.msra.gmra.mxu2 %vm376_vm1, %v2035_v21 }
 0x150   : > { %v467_v31 = vpop.permute.xlu0 %466 }
 0x151   : > { %1395 = vmatpush.xpose.msk.msrb.mxu3 %vm376_vm1, %v467_v31 }
 0x154   : > { %1392 = vmatmul.msk.f32.gmra.mxu2 %vm376_vm1, %v2039_v23 }
 0x158   : > { %v463_v36 = vpop.permute.xlu0 %462 }
 0x160   : > { %v661_v40 = vpop.permute.xlu0 %660 }
 0x168   : > { %v659_v46 = vpop.permute.xlu0 %658 }
 0x170   : > { %v563_v49 = vpop.permute.xlu0 %562 }
 0x178   : > { %v559_v51 = vpop.permute.xlu0 %558 }
 0x180   : > { %v561_v53 = vpop.permute.xlu0 %560 }
 0x188   : > { %v849_v0 = vpop.permute.xlu0 %848 }
 0x190   : > { %v1043_v3 = vpop.permute.xlu0 %1042 }
 0x198   : > { %v949_v6 = vpop.permute.xlu0 %948 }
 0x1a0   : > { %v943_v16 = vpop.permute.xlu0 %942 }
 0x1cf   : > { %v402_v32 = vpop.f32.mrf.mxu2 }
 0x1d0   : > { %v409_v33 = vsel %vm408_vm2, %v402_v32, -inf }
 0x1d1   : > { %410 = vmax.xlane.f32.xlu1 %v409_v33 }
 0x1d7   : > { %v405_v34 = vpop.f32.mrf.mxu2 }
 0x1d8   : > { %v412_v35 = vsel %vm408_vm2, %v405_v34, -inf }
 0x1d9   : > { %413 = vmax.xlane.f32.xlu1 %v412_v35 }
 0x1f2   : > { %464 = vrot.lane.b32.xlu1 %v2035_v21, %s1851_s16 }
 0x1fa   : > { %564 = vrot.lane.b32.xlu1 %v2039_v23, %s1853_s26 }
 0x202   : > { %852 = vrot.lane.b32.xlu1 %v2039_v23, %s1859_s7 }
 0x20a   : > { %846 = vrot.lane.b32.xlu1 %v2035_v21, %s1855_s13 }
 0x212   : > { %754 = vrot.lane.b32.xlu1 %v2035_v21, %s1860_s8 }
 0x21a   : > { %750 = vrot.lane.b32.xlu1 %v2035_v21, %s1861_s11 }
 0x222   : > { %752 = vrot.lane.b32.xlu1 %v2039_v23, %s1861_s11 }
 0x22a   : > { %1040 = vrot.lane.b32.xlu1 %v2039_v23, %s1862_s29 }
 0x244   : > { %v411_v37 = vpop.xlane.xlu1 %410 }
 0x245   : > { %v415_v38 = vsub.f32 %v402_v32, %v411_v37 }
 0x247   : > { %v417_v39 = vmul.f32 1.442695, %v415_v38 }
 0x249   : > { %1581 = vpow2.f32 %v417_v39 }
 0x24c   : > { %v414_v41 = vpop.xlane.xlu1 %413 }
 0x24d   : > { %v416_v42 = vsub.f32 %v405_v34, %v414_v41 }
 0x24f   : > { %v1582_v43 = vpop.eup %1581  ;;  %v419_v44 = vmul.f32 1.442695, %v416_v42 }
 0x250   : > { %v421_v45 = vsel %vm408_vm2, %v1582_v43, 0.0 }
 0x251   : > { %1583 = vpow2.f32 %v419_v44  ;;  %422 = vadd.xlane.f32.xlu2 %v421_v45 }
 0x257   : > { %v1584_v47 = vpop.eup %1583 }
 0x258   : > { %v424_v48 = vsel %vm408_vm2, %v1584_v47, 0.0 }
 0x259   : > { %425 = vadd.xlane.f32.xlu2 %v424_v48 }
 0x264   : > { %v465_v50 = vpop.permute.xlu1 %464 }
 0x265   : > { %1396 = vmatpush.xpose.msk.msrb.mxu3 %vm376_vm1, %v465_v50 }
 0x26c   : > { %v565_v52 = vpop.permute.xlu1 %564 }
 0x26d   : > { %1401 = vmatpush.xpose.msk.msrb.mxu0 %vm376_vm1, %v565_v52  ;;  %1446 = vmatpush.xpose.msk.msrb.mxu1 %vm376_vm1, %v565_v52 }
 0x271   : > { %656 = vrot.lane.b32.xlu2 %v2039_v23, %s1850_s28  ;;  %1402 = vmatpush.xpose.msk.msrb.mxu0 %vm376_vm1, %v563_v49 }
 0x272   : > { %1447 = vmatpush.xpose.msk.msrb.mxu1 %vm376_vm1, %v563_v49 }
 0x274   : > { %1403 = vmatmul.msk.f32.vlgmr.msrb.gmra.mxu0 %vm376_vm1, %v559_v51  ;;  %v853_v58 = vpop.permute.xlu1 %852 }
 0x275   : > { %1404 = vmatmul.msk.f32.vlgmr.msrb.gmra.mxu1 %vm376_vm1, %v561_v53 }
 0x279   : > { %850 = vrot.lane.b32.xlu2 %v2035_v21, %s1859_s7 }
 0x27c   : > { %v847_v1 = vpop.permute.xlu1 %846 }
 0x281   : > { %756 = vrot.lane.b32.xlu2 %v2039_v23, %s1860_s8 }
 0x284   : > { %v755_v4 = vpop.permute.xlu1 %754 }
 0x289   : > { %1044 = vrot.lane.b32.xlu2 %v2039_v23, %s1856_s12 }
 0x28c   : > { %v751_v7 = vpop.permute.xlu1 %750 }
 0x291   : > { %1038 = vrot.lane.b32.xlu2 %v2035_v21, %s1862_s29 }
 0x294   : > { %v753_v12 = vpop.permute.xlu1 %752 }
 0x299   : > { %946 = vrot.lane.b32.xlu2 %v2035_v21, %s1857_s14 }
 0x29c   : > { %v1041_v19 = vpop.permute.xlu1 %1040 }
 0x2a1   : > { %944 = vrot.lane.b32.xlu2 %v2039_v23, %s1858_s15 }
 0x2c4   : > { %v423_v56 = vpop.xlane.xlu2 %422 }
 0x2c5   : > { %1585 = vrcp.f32 %v423_v56 }
 0x2cb   : > { %v1586_v57 = vpop.eup %1585 }
 0x2cc   : > { %v426_v59 = vpop.xlane.xlu2 %425  ;;  %v429_v60 = vmul.f32 %v1586_v57, %v1582_v43 }
 0x2cd   : > { %1587 = vrcp.f32 %v426_v59 }
 0x2ce   : > { %1393 = vmatmul.msk.f32.vlgmr.msra.gmra.mxu3 %vm408_vm2, %v429_v60 }
 0x2cf   : > { %1407 = vmatpush.xpose.msk.msra.mxu3 %vm376_vm1, %v661_v40 }
 0x2d3   : > { %v1588_v61 = vpop.eup %1587  ;;  %1408 = vmatpush.xpose.msk.msra.mxu3 %vm376_vm1, %v659_v46 }
 0x2d4   : > { %v657_v62 = vpop.permute.xlu2 %656  ;;  %v430_v63 = vmul.f32 %v1588_v61, %v1584_v47 }
 0x2d6   : > { %1394 = vmatmul.msk.f32.gmra.mxu3 %vm408_vm2, %v430_v63 }
 0x2dc   : > { %v851_v2 = vpop.permute.xlu2 %850 }
 0x2de   : > { %1397 = vmatmul.msk.f32.vlgmr.msrb.gmra.mxu3 %vm376_vm1, %v461_v54 }
 0x2df   : > { %1419 = vmatpush.xpose.msk.msrb.mxu3 %vm376_vm1, %v853_v58 }
 0x2e3   : > { %1420 = vmatpush.xpose.msk.msrb.mxu3 %vm376_vm1, %v851_v2 }
 0x2e4   : > { %v757_v5 = vpop.permute.xlu2 %756 }
 0x2e5   : > { %1413 = vmatpush.xpose.msk.msra.mxu0 %vm376_vm1, %v757_v5 }
 0x2e6   : > { %1398 = vmatmul.msk.f32.gmra.mxu3 %vm376_vm1, %v463_v36 }
 0x2e9   : > { %1414 = vmatpush.xpose.msk.msra.mxu0 %vm376_vm1, %v755_v4 }
 0x2ec   : > { %v1045_v8 = vpop.permute.xlu2 %1044  ;;  %1415 = vmatmul.msk.f32.vlgmr.msra.gmra.mxu0 %vm376_vm1, %v751_v7 }
 0x2ed   : > { %1425 = vmatpush.xpose.msk.msrb.mxu0 %vm376_vm1, %v949_v6 }
 0x2ee   : > { %1409 = vmatmul.msk.f32.vlgmr.msra.gmra.mxu3 %vm376_vm1, %v655_v55 }
 0x2ef   : > { %1431 = vmatpush.xpose.msk.msra.mxu3 %vm376_vm1, %v1045_v8 }
 0x2f1   : > { %v591_v9 = vpop.f32.mrf.mxu0 }
 0x2f2   : > { %v594_v10 = vpop.f32.mrf.mxu1  ;;  %v597_v11 = vsel %vm408_vm2, %v591_v9, -inf }
 0x2f3   : > { %1432 = vmatpush.xpose.msk.msra.mxu3 %vm376_vm1, %v1043_v3  ;;  %598 = vmax.xlane.f32.xlu1 %v597_v11  ;;  %v600_v13 = vsel %vm408_vm2, %v594_v10, -inf }
 0x2f4   : > { %601 = vmax.xlane.f32.xlu0 %v600_v13  ;;  %v1039_v14 = vpop.permute.xlu2 %1038  ;;  %1416 = vmatmul.msk.f32.gmra.mxu0 %vm376_vm1, %v753_v12 }
 0x2f6   : > { %1410 = vmatmul.msk.f32.gmra.mxu3 %vm376_vm1, %v657_v62 }
 0x2fc   : > { %v947_v15 = vpop.permute.xlu2 %946 }
 0x2fd   : > { %1426 = vmatpush.xpose.msk.msrb.mxu0 %vm376_vm1, %v947_v15 }
 0x2fe   : > { %1421 = vmatmul.msk.f32.vlgmr.msrb.gmra.mxu3 %vm376_vm1, %v847_v1 }
 0x300   : > { %1427 = vmatmul.msk.f32.vlgmr.msrb.gmra.mxu0 %vm376_vm1, %v943_v16 }
 0x304   : > { %v945_v18 = vpop.permute.xlu2 %944 }
 0x306   : > { %1422 = vmatmul.msk.f32.gmra.mxu3 %vm376_vm1, %v849_v0 }
 0x308   : > { %1428 = vmatmul.msk.f32.gmra.mxu0 %vm376_vm1, %v945_v18  ;;  %1546 = vrot.lane.b32.xlu0 %v2145_v17, %s1848_s24 }
 0x30e   : > { %1433 = vmatmul.msk.f32.vlgmr.msra.gmra.mxu3 %vm376_vm1, %v1039_v14 }
 0x316   : > { %1434 = vmatmul.msk.f32.gmra.mxu3 %vm376_vm1, %v1041_v19 }
 0x351   : > { %v2166_v35 = vpop.f32.mrf.mxu3 }
 0x359   : > { %v2169_v38 = vpop.f32.mrf.mxu3 }
 0x361   : > { %v2173_v39 = vpop.f32.mrf.mxu3 }
 0x362   : > { %v499_v48 = vsel %vm408_vm2, %v2173_v39, -inf }
 0x366   : > { %v599_v24 = vpop.xlane.xlu1 %598 }
 0x367   : > { %v603_v25 = vsub.f32 %v591_v9, %v599_v24  ;;  %v602_v28 = vpop.xlane.xlu0 %601 }
 0x368   : > { %v604_v41 = vsub.f32 %v594_v10, %v602_v28 }
 0x369   : > { %v783_v20 = vpop.f32.mrf.mxu0  ;;  %v605_v29 = vmul.f32 1.442695, %v603_v25  ;;  %v2177_v40 = vpop.f32.mrf.mxu3 }
 0x36a   : > { %v789_v21 = vsel %vm408_vm2, %v783_v20, -inf  ;;  %v607_v43 = vmul.f32 1.442695, %v604_v41  ;;  %v502_v62 = vsel %vm408_vm2, %v2177_v40, -inf }
 0x36b   : > { %790 = vmax.xlane.f32.xlu2 %v789_v21  ;;  %1589 = vpow2.f32 %v605_v29 }
 0x36c   : > { %1591 = vpow2.f32 %v607_v43 }
 0x371   : > { %v2154_v22 = vpop.f32.mrf.mxu0  ;;  %v1590_v36 = vpop.eup %1589 }
 0x372   : > { %v792_v23 = vsel %vm408_vm2, %v2154_v22, -inf  ;;  %v609_v37 = vsel %vm408_vm2, %v1590_v36, 0.0  ;;  %v2179_v42 = vpop.f32.mrf.mxu3  ;;  %v1592_v45 = vpop.eup %1591 }
 0x373   : > { %793 = vmax.xlane.f32.xlu1 %v792_v23  ;;  %v612_v46 = vsel %vm408_vm2, %v1592_v45, 0.0  ;;  %v693_v49 = vsel %vm408_vm2, %v2179_v42, -inf }
 0x37a   : > { %v1547_v32 = vpop.permute.xlu0 %1546  ;;  %v2181_v44 = vpop.f32.mrf.mxu3 }
 0x37b   : > { %v1548_v33 = vunpack.i.l.bf16 %v1547_v32  ;;  %v1549_v34 = vunpack.i.h.bf16 %v1547_v32  ;;  %v696_v52 = vsel %vm408_vm2, %v2181_v44, -inf }
 0x37d   : > { %v2158_v26 = vpop.f32.mrf.mxu0  ;;  %549 = vmatpush.msrb.mxu2 %v1548_v33 }
 0x37e   : > { %v981_v27 = vsel %vm408_vm2, %v2158_v26, -inf }
 0x37f   : > { %982 = vmax.xlane.f32.xlu1 %v981_v27  ;;  %550 = vmatpush.msrb.mxu2 %v1549_v34 }
 0x382   : > { %v879_v47 = vpop.f32.mrf.mxu3 }
 0x383   : > { %v885_v51 = vsel %vm408_vm2, %v879_v47, -inf }
 0x385   : > { %v2162_v30 = vpop.f32.mrf.mxu0 }
 0x386   : > { %v984_v31 = vsel %vm408_vm2, %v2162_v30, -inf }
 0x387   : > { %985 = vmax.xlane.f32.xlu2 %v984_v31 }
 0x38a   : > { %v2188_v50 = vpop.f32.mrf.mxu3 }
 0x38b   : > { %v888_v1 = vsel %vm408_vm2, %v2188_v50, -inf }
 0x38f   : > { %610 = vadd.xlane.f32.xlu2 %v609_v37 }
 0x392   : > { %v2193_v53 = vpop.f32.mrf.mxu3 }
 0x393   : > { %v1077_v56 = vsel %vm408_vm2, %v2193_v53, -inf }
 0x398   : > { %1551 = vrot.lane.b32.xlu1 %v2145_v17, %s1850_s28 }
 0x39a   : > { %v2197_v58 = vpop.f32.mrf.mxu3 }
 0x39b   : > { %v1080_v59 = vsel %vm408_vm2, %v2197_v58, -inf }
 0x3a7   : > { %1556 = vrot.lane.b32.xlu2 %v2145_v17, %s1854_s6 }
 0x3c2   : > { %613 = vadd.xlane.f32.xlu1 %v612_v46 }
 0x3ca   : > { %500 = vmax.xlane.f32.xlu1 %v499_v48 }
 0x3d0   : > { %694 = vmax.xlane.f32.xlu2 %v693_v49 }
 0x3d2   : > { %886 = vmax.xlane.f32.xlu1 %v885_v51 }
 0x3d8   : > { %697 = vmax.xlane.f32.xlu2 %v696_v52 }
 0x3de   : > { %v791_v54 = vpop.xlane.xlu2 %790 }
 0x3df   : > { %v795_v55 = vsub.f32 %v783_v20, %v791_v54 }
 0x3e0   : > { %1078 = vmax.xlane.f32.xlu2 %v1077_v56 }
 0x3e1   : > { %v797_v57 = vmul.f32 1.442695, %v795_v55 }
 0x3e3   : > { %1593 = vpow2.f32 %v797_v57 }
 0x3e6   : > { %v2207_v63 = vpop.xlane.xlu1 %793 }
 0x3e7   : > { %v796_v52 = vsub.f32 %v2154_v22, %v2207_v63 }
 0x3e8   : > { %1081 = vmax.xlane.f32.xlu2 %v1080_v59 }
 0x3e9   : > { %v2201_v60 = vpop.eup %1593  ;;  %v799_v57 = vmul.f32 1.442695, %v796_v52 }
 0x3ea   : > { %v801_v61 = vsel %vm408_vm2, %v2201_v60, 0.0 }
 0x3eb   : > { %802 = vadd.xlane.f32.xlu0 %v801_v61 }
 0x3f2   : > { %v983_v2 = vpop.xlane.xlu1 %982 }
 0x3f3   : > { %503 = vmax.xlane.f32.xlu0 %v502_v62  ;;  %v987_v41 = vsub.f32 %v2158_v26, %v983_v2 }
 0x3fa   : > { %v2209_v0 = vpop.xlane.xlu2 %985 }
 0x3fb   : > { %889 = vmax.xlane.f32.xlu0 %v888_v1 }
 0x402   : > { %v611_v3 = vpop.xlane.xlu2 %610 }
 0x403   : > { %1595 = vrcp.f32 %v611_v3 }
 0x409   : > { %v1596_v6 = vpop.eup %1595 }
 0x40a   : > { %v1552_v4 = vpop.permute.xlu1 %1551  ;;  %v1557_v5 = vpop.permute.xlu2 %1556  ;;  %v617_v11 = vmul.f32 %v1596_v6, %v1590_v36 }
 0x40b   : > { %v1553_v7 = vunpack.i.l.bf16 %v1552_v4  ;;  %v1558_v8 = vunpack.i.l.bf16 %v1557_v5  ;;  %v1554_v9 = vunpack.i.h.bf16 %v1552_v4  ;;  %v1559_v10 = vunpack.i.h.bf16 %v1557_v5 }
 0x40d   : > { %645 = vmatpush.msra.mxu1 %v1558_v8  ;;  %741 = vmatpush.msra.mxu2 %v1553_v7 }
 0x40f   : > { %646 = vmatpush.msra.mxu1 %v1559_v10  ;;  %742 = vmatpush.msra.mxu2 %v1554_v9  ;;  %v988_v10 = vsub.f32 %v2162_v30, %v2209_v0 }
 0x410   : > { %1405 = vmatmul.msk.f32.vlgmr.msra.gmra.mxu1 %vm408_vm2, %v617_v11 }
 0x435   : > { %v614_v12 = vpop.xlane.xlu1 %613 }
 0x436   : > { %1597 = vrcp.f32 %v614_v12 }
 0x43c   : > { %v1598_v13 = vpop.eup %1597 }
 0x43d   : > { %v501_v14 = vpop.xlane.xlu1 %500  ;;  %v618_v15 = vmul.f32 %v1598_v13, %v1592_v45  ;;  %v991_v13 = vmul.f32 1.442695, %v988_v10 }
 0x43e   : > { %v505_v16 = vsub.f32 %v2173_v39, %v501_v14 }
 0x43f   : > { %1406 = vmatmul.msk.f32.gmra.mxu1 %vm408_vm2, %v618_v15 }
 0x440   : > { %v507_v18 = vmul.f32 1.442695, %v505_v16 }
 0x442   : > { %1599 = vpow2.f32 %v507_v18 }
 0x443   : > { %v695_v29 = vpop.xlane.xlu2 %694 }
 0x444   : > { %v699_v33 = vsub.f32 %v2179_v42, %v695_v29 }
 0x445   : > { %v887_v19 = vpop.xlane.xlu1 %886 }
 0x446   : > { %v891_v20 = vsub.f32 %v879_v47, %v887_v19  ;;  %v701_v37 = vmul.f32 1.442695, %v699_v33 }
 0x448   : > { %v2216_v21 = vpop.eup %1599  ;;  %v893_v23 = vmul.f32 1.442695, %v891_v20 }
 0x449   : > { %v511_v24 = vsel %vm408_vm2, %v2216_v21, 0.0 }
 0x44a   : > { %1601 = vpow2.f32 %v893_v23  ;;  %512 = vadd.xlane.f32.xlu0 %v511_v24 }
 0x44b   : > { %v698_v36 = vpop.xlane.xlu2 %697 }
 0x44c   : > { %v700_v42 = vsub.f32 %v2181_v44, %v698_v36 }
 0x44e   : > { %v703_v49 = vmul.f32 1.442695, %v700_v42 }
 0x450   : > { %v2220_v25 = vpop.eup %1601 }
 0x451   : > { %v897_v27 = vsel %vm408_vm2, %v2220_v25, 0.0 }
 0x452   : > { %898 = vadd.xlane.f32.xlu2 %v897_v27 }
 0x453   : > { %v1079_v45 = vpop.xlane.xlu2 %1078 }
 0x454   : > { %v1083_v44 = vsub.f32 %v2193_v53, %v1079_v45 }
 0x456   : > { %v1085_v61 = vmul.f32 1.442695, %v1083_v44 }
 0x45b   : > { %v1082_v54 = vpop.xlane.xlu2 %1081 }
 0x45c   : > { %v1084_v56 = vsub.f32 %v2197_v58, %v1082_v54 }
 0x45e   : > { %1561 = vrot.lane.b32.xlu0 %v2145_v17, %s1855_s13  ;;  %v2226_v28 = vpop.xlane.xlu0 %802  ;;  %v1087_v62 = vmul.f32 1.442695, %v1084_v56 }
 0x466   : > { %v504_v31 = vpop.xlane.xlu0 %503 }
 0x467   : > { %v506_v32 = vsub.f32 %v2177_v40, %v504_v31  ;;  %v989_v40 = vmul.f32 1.442695, %v987_v41 }
 0x469   : > { %v509_v34 = vmul.f32 1.442695, %v506_v32 }
 0x46a   : > { %1566 = vrot.lane.b32.xlu2 %v2145_v17, %s1861_s11 }
 0x46b   : > { %1603 = vpow2.f32 %v509_v34 }
 0x46c   : > { %1605 = vpow2.f32 %v701_v37 }
 0x46d   : > { %1607 = vpow2.f32 %v989_v40 }
 0x46e   : > { %v890_v46 = vpop.xlane.xlu0 %889  ;;  %1609 = vpow2.f32 %v703_v49 }
 0x46f   : > { %v892_v48 = vsub.f32 %v2188_v50, %v890_v46 }
 0x471   : > { %v2232_v39 = vpop.eup %1603  ;;  %v895_v26 = vmul.f32 1.442695, %v892_v48 }
 0x472   : > { %v514_v43 = vsel %vm408_vm2, %v2232_v39, 0.0  ;;  %v2238_v47 = vpop.eup %1605 }
 0x473   : > { %515 = vadd.xlane.f32.xlu1 %v514_v43  ;;  %v705_v51 = vsel %vm408_vm2, %v2238_v47, 0.0  ;;  %v2245_v55 = vpop.eup %1607  ;;  %1611 = vpow2.f32 %v895_v26 }
 0x474   : > { %v993_v50 = vsel %vm408_vm2, %v2245_v55, 0.0  ;;  %v2251_v59 = vpop.eup %1609  ;;  %1613 = vpow2.f32 %v799_v57 }
 0x475   : > { %v708_v63 = vsel %vm408_vm2, %v2251_v59, 0.0  ;;  %1615 = vpow2.f32 %v1085_v61 }
 0x476   : > { %1617 = vpow2.f32 %v1087_v62 }
 0x479   : > { %v2253_v22 = vpop.eup %1611 }
 0x47a   : > { %v900_v53 = vsel %vm408_vm2, %v2253_v22, 0.0  ;;  %v2259_v58 = vpop.eup %1613 }
 0x47b   : > { %706 = vadd.xlane.f32.xlu1 %v705_v51  ;;  %v2261_v1 = vpop.eup %1615  ;;  %v804_v3 = vsel %vm408_vm2, %v2259_v58, 0.0 }
 0x47c   : > { %v2263_v2 = vpop.eup %1617  ;;  %v1089_v5 = vsel %vm408_vm2, %v2261_v1, 0.0 }
 0x47d   : > { %v1092_v4 = vsel %vm408_vm2, %v2263_v2, 0.0 }
 0x483   : > { %994 = vadd.xlane.f32.xlu1 %v993_v50 }
 0x488   : > { %709 = vadd.xlane.f32.xlu0 %v708_v63 }
 0x48b   : > { %901 = vadd.xlane.f32.xlu1 %v900_v53 }
 0x48d   : > { %v648_v6 = vpop.f32.mrf.mxu1 }
 0x490   : > { %805 = vadd.xlane.f32.xlu0 %v804_v3 }
 0x493   : > { %1093 = vadd.xlane.f32.xlu2 %v1092_v4  ;;  %1090 = vadd.xlane.f32.xlu1 %v1089_v5 }
 0x4a4   : > { %1576 = vrot.lane.b32.xlu0 %v2145_v17, %s1858_s15 }
 0x4ab   : > { %1144 = vrot.lane.b32.xlu2 %v648_v6, %s1857_s14 }
 0x4ac   : > { %1571 = vrot.lane.b32.xlu1 %v2145_v17, %s1862_s29  ;;  %s1785_s29 = scalar_lea.hbm %s2384_s5, 32 }
 0x4bc   : > { %v651_v7 = vpop.f32.mrf.mxu1 }
 0x4bd   : > { %1146 = vrot.lane.b32.xlu2 %v651_v7, %s1857_s14  ;;  %v513_v8 = vpop.xlane.xlu0 %512 }
 0x4be   : > { %1619 = vrcp.f32 %v513_v8  ;;  %v1216_v8 = vld [vmem:[#allocation8 + $0x38] sm:$0xff] }
 0x4bf   : > { %1621 = vrcp.f32 %v2226_v28  ;;  %1235 = vmatpush.msra.mxu0 %v1216_v8 }
 0x4c0   : > { %1623 = vpow2.f32 %v991_v13  ;;  %v1212_v13 = vld [vmem:[#allocation8 + $0x18] sm:$0xff] }
 0x4c4   : > { %v1620_v9 = vpop.eup %1619 }
 0x4c5   : > { %v899_v11 = vpop.xlane.xlu2 %898  ;;  %v519_v12 = vmul.f32 %v1620_v9, %v2216_v21  ;;  %v1622_v17 = vpop.eup %1621  ;;  %v1215_v9 = vld [vmem:[#allocation8 + $0x30] sm:$0xff] }
 0x4c6   : > { %v809_v19 = vmul.f32 %v1622_v17, %v2201_v60  ;;  %v2283_v23 = vpop.eup %1623  ;;  %1236 = vmatpush.msra.mxu0 %v1215_v9  ;;  %v1210_v17 = vld [vmem:[#allocation8 + $0x8] sm:$0xff] }
 0x4c7   : > { %1399 = vmatmul.msk.f32.vlgmr.msrb.gmra.mxu2 %vm408_vm2, %v519_v12  ;;  %v996_v0 = vsel %vm408_vm2, %v2283_v23, 0.0  ;;  %v1213_v12 = vld [vmem:[#allocation8 + $0x20] sm:$0xff] }
 0x4cd   : > { %v1567_v14 = vpop.permute.xlu2 %1566 }
 0x4ce   : > { %v1568_v15 = vunpack.i.l.bf16 %v1567_v14  ;;  %v1569_v16 = vunpack.i.h.bf16 %v1567_v14  ;;  %v1211_v14 = vld [vmem:[#allocation8 + $0x10] sm:$0xff] }
 0x4d0   : > { %837 = vmatpush.msrb.mxu1 %v1568_v15  ;;  %v1562_v18 = vpop.permute.xlu0 %1561  ;;  %v1209_v15 = vld [vmem:[#allocation8] sm:$0xff] }
 0x4d1   : > { %v1563_v20 = vunpack.i.l.bf16 %v1562_v18  ;;  %v1564_v30 = vunpack.i.h.bf16 %v1562_v18 }
 0x4d2   : > { %838 = vmatpush.msrb.mxu1 %v1569_v16 }
 0x4d3   : > { %1417 = vmatmul.msk.f32.vlgmr.msrb.gmra.mxu1 %vm408_vm2, %v809_v19  ;;  %933 = vmatpush.msrb.mxu2 %v1563_v20 }
 0x4d5   : > { %934 = vmatpush.msrb.mxu2 %v1564_v30 }
 0x4d6   : > { %997 = vadd.xlane.f32.xlu1 %v996_v0 }
 0x4e6   : > { %v516_v21 = vpop.xlane.xlu1 %515 }
 0x4e7   : > { %1625 = vrcp.f32 %v516_v21 }
 0x4ed   : > { %v1626_v24 = vpop.eup %1625 }
 0x4ee   : > { %v707_v27 = vpop.xlane.xlu1 %706  ;;  %v520_v28 = vmul.f32 %v1626_v24, %v2232_v39 }
 0x4ef   : > { %1627 = vrcp.f32 %v707_v27 }
 0x4f0   : > { %1400 = vmatmul.msk.f32.gmra.mxu2 %vm408_vm2, %v520_v28 }
 0x4f5   : > { %v1628_v60 = vpop.eup %1627 }
 0x4f6   : > { %v713_v29 = vmul.f32 %v1628_v60, %v2238_v47  ;;  %v995_v32 = vpop.xlane.xlu1 %994 }
 0x4f8   : > { %1411 = vmatmul.msk.f32.vlgmr.msra.gmra.mxu2 %vm408_vm2, %v713_v29 }
 0x4fb   : > { %v710_v31 = vpop.xlane.xlu0 %709 }
 0x4fc   : > { %1629 = vrcp.f32 %v710_v31 }
 0x4fd   : > { %1631 = vrcp.f32 %v899_v11  ;;  %v1214_v11 = vld [vmem:[#allocation8 + $0x28] sm:$0xff] }
 0x4fe   : > { %v902_v37 = vpop.xlane.xlu1 %901  ;;  %1237 = vmatpush.msra.mxu0 %v1214_v11 }
 0x500   : > { %1238 = vmatpush.msra.mxu0 %v1213_v12 }
 0x502   : > { %v1630_v33 = vpop.eup %1629  ;;  %1239 = vmatpush.msra.mxu0 %v1212_v13 }
 0x503   : > { %v806_v34 = vpop.xlane.xlu0 %805  ;;  %v714_v36 = vmul.f32 %v1630_v33, %v2251_v59  ;;  %v1632_v39 = vpop.eup %1631 }
 0x504   : > { %1633 = vrcp.f32 %v806_v34  ;;  %v905_v43 = vmul.f32 %v1632_v39, %v2220_v25  ;;  %1240 = vmatpush.msra.mxu0 %v1211_v14 }
 0x505   : > { %1412 = vmatmul.msk.f32.gmra.mxu2 %vm408_vm2, %v714_v36  ;;  %1635 = vrcp.f32 %v902_v37 }
 0x506   : > { %1637 = vrcp.f32 %v995_v32  ;;  %v1091_v46 = vpop.xlane.xlu1 %1090  ;;  %v1094_v26 = vpop.xlane.xlu2 %1093  ;;  %1241 = vmatpush.msra.mxu0 %v1210_v17 }
 0x507   : > { %1639 = vrcp.f32 %v1091_v46 }
 0x508   : > { %1641 = vrcp.f32 %v1094_v26  ;;  %1242 = vmatpush.msra.mxu0 %v1209_v15 }
 0x50a   : > { %v1634_v41 = vpop.eup %1633 }
 0x50b   : > { %v810_v45 = vmul.f32 %v1634_v41, %v2259_v58  ;;  %v1636_v40 = vpop.eup %1635 }
 0x50c   : > { %v906_v42 = vmul.f32 %v1636_v40, %v2253_v22  ;;  %v1638_v48 = vpop.eup %1637 }
 0x50d   : > { %1418 = vmatmul.msk.f32.gmra.mxu1 %vm408_vm2, %v810_v45  ;;  %1423 = vmatmul.msk.f32.vlgmr.msrb.gmra.mxu2 %vm408_vm2, %v905_v43  ;;  %v1001_v25 = vmul.f32 %v1638_v48, %v2245_v55  ;;  %v1640_v54 = vpop.eup %1639 }
 0x50e   : > { %v1097_v57 = vmul.f32 %v1640_v54, %v2261_v1  ;;  %v1642_v50 = vpop.eup %1641  ;;  %v1145_v18 = vpop.permute.xlu2 %1144 }
 0x50f   : > { %v1098_v59 = vmul.f32 %v1642_v50, %v2263_v2 }
 0x515   : > { %1424 = vmatmul.msk.f32.gmra.mxu2 %vm408_vm2, %v906_v42 }
 0x516   : > { %v1577_v47 = vpop.permute.xlu0 %1576 }
 0x517   : > { %v1578_v49 = vunpack.i.l.bf16 %v1577_v47  ;;  %v1579_v51 = vunpack.i.h.bf16 %v1577_v47  ;;  %v1147_v20 = vpop.permute.xlu2 %1146 }
 0x519   : > { %1029 = vmatpush.msra.mxu1 %v1578_v49 }
 0x51b   : > { %1030 = vmatpush.msra.mxu1 %v1579_v51 }
 0x51c   : > { %1429 = vmatmul.msk.f32.vlgmr.msra.gmra.mxu1 %vm408_vm2, %v1001_v25 }
 0x51e   : > { %v1572_v52 = vpop.permute.xlu1 %1571 }
 0x51f   : > { %v1573_v44 = vunpack.i.l.bf16 %v1572_v52  ;;  %v1574_v56 = vunpack.i.h.bf16 %v1572_v52 }
 0x521   : > { %1125 = vmatpush.msra.mxu2 %v1573_v44 }
 0x523   : > { %1126 = vmatpush.msra.mxu2 %v1574_v56 }
 0x524   : > { %1435 = vmatmul.msk.f32.vlgmr.msra.gmra.mxu2 %vm408_vm2, %v1097_v57 }
 0x52c   : > { %1436 = vmatmul.msk.f32.gmra.mxu2 %vm408_vm2, %v1098_v59 }
 0x549   : > { %v998_v55 = vpop.xlane.xlu1 %997 }
 0x54a   : > { %1643 = vrcp.f32 %v998_v55  ;;  %v552_v63 = vpop.f32.mrf.mxu2 }
 0x550   : > { %v1644_v61 = vpop.eup %1643  ;;  %v840_v62 = vpop.f32.mrf.mxu1 }
 0x551   : > { %1160 = vrot.lane.b32.xlu0 %v840_v62, %s1860_s8  ;;  %v1002_v22 = vmul.f32 %v1644_v61, %v2283_v23 }
 0x553   : > { %1430 = vmatmul.msk.f32.gmra.mxu1 %vm408_vm2, %v1002_v22 }
 0x559   : > { %1136 = vrot.lane.b32.xlu0 %v552_v63, %s1856_s12 }
 0x573   : > { %v555_v53 = vpop.f32.mrf.mxu2 }
 0x57b   : > { %v744_v58 = vpop.f32.mrf.mxu2 }
 0x57c   : > { %1152 = vrot.lane.b32.xlu0 %v744_v58, %s1859_s7 }
 0x588   : > { %v747_v1 = vpop.f32.mrf.mxu2 }
 0x58a   : > { %v843_v2 = vpop.f32.mrf.mxu1 }
 0x58b   : > { %1162 = vrot.lane.b32.xlu2 %v843_v2, %s1860_s8 }
 0x590   : > { %v936_v3 = vpop.f32.mrf.mxu2 }
 0x591   : > { %1168 = vrot.lane.b32.xlu1 %v936_v3, %s1852_s23 }
 0x598   : > { %v939_v5 = vpop.f32.mrf.mxu2 }
 0x599   : > { %v1032_v4 = vpop.f32.mrf.mxu1 }
 0x59a   : > { %1176 = vrot.lane.b32.xlu0 %v1032_v4, %s1853_s26 }
 0x5a2   : > { %1138 = vrot.lane.b32.xlu0 %v555_v53, %s1856_s12 }
 0x5a7   : > { %v1128_v6 = vpop.f32.mrf.mxu2 }
 0x5a8   : > { %1184 = vrot.lane.b32.xlu2 %v1128_v6, %s1851_s16 }
 0x5aa   : > { %1154 = vrot.lane.b32.xlu0 %v747_v1, %s1859_s7  ;;  %s1253_s7 = scalar_lea.sflag [#allocation4], %s2009_s17 }
 0x5af   : > { %v1131_v7 = vpop.f32.mrf.mxu2 }
 0x5b0   : > { %1186 = vrot.lane.b32.xlu2 %v1131_v7, %s1851_s16  ;;  %s292_s16 = scalar_lea.vmem [#allocation10], %s1380_s27 }
 0x5b1   : > { %s1265_s14 = sshll.u32 %s292_s16, 4  ;;  %s1266_s14 = int_to_ptr.vmem [resolvable:$true] %s1265_s14 }
 0x5b2   : > { %1170 = vrot.lane.b32.xlu0 %v939_v5, %s1852_s23  ;;  %s1445_s23 = sshll.u32 %s1915_s22, 4 }
 0x5b3   : > { %s1264_s13 = scalar_lea.hbm %s2384_s5, %s1445_s23 }
 0x5b4   : > { %s1267_s15 = sshll.u32 %s1264_s13, 4  ;;  %s1268_s15 = int_to_ptr.hbm [resolvable:$true] %s1267_s15 }
 0x5b5   : > { %s1779_s8 = sshra.s32 %s1268_s15, 4  ;;  %s1780_s8 = int_to_ptr.hbm [resolvable:$true] %s1779_s8 }
 0x5b6   : > { %s1781_s27 = scalar_lea.hbm %s1780_s8, 16  ;;  %p1786_p11 = scmp.lt.s32.totalorder %s1780_s8, %s2384_s5 }
 0x5b7   : > { %p1782_p1 = scmp.ne.s32.totalorder %s1780_s8, %s1781_s27  ;;  %p1787_p9 = scmp.lt.s32.totalorder %s1785_s29, %s1781_s27 }
 0x5b9   : > { %p1783_p4 = pnand %p1782_p1, %p1979_p3  ;;  %p1788_p2 = por %p1787_p9, %p1786_p11 }
 0x5bb   : > { %p1784_p8 = pneg %p1783_p4 }
 0x5bd   : > { %p1789_p10 = pnand %p1788_p2, %p1784_p8 }
 0x5c3   : > { %v1161_v16 = vpop.permute.xlu0 %1160 }
 0x5cb   : > { %v1137_v19 = vpop.permute.xlu0 %1136 }
 0x5cc   : > { %v1190_v23 = vsel %vm376_vm1, %v2166_v35, %v1137_v19 }
 0x5cd   : > { %v1192_v21 = vsel %vm408_vm2, %v1190_v23, %v1145_v18 }
 0x5d0   : > { %v1035_v10 = vpop.f32.mrf.mxu1 }
 0x5d1   : > { %1178 = vrot.lane.b32.xlu1 %v1035_v10, %s1853_s26 }
 0x5e5   : > { %v1163_v0 = vpop.permute.xlu2 %1162 }
 0x5ee   : > { %v1153_v30 = vpop.permute.xlu0 %1152 }
 0x5ef   : > { %v1195_v24 = vsel %vm1194_vm3, %v1192_v21, %v1153_v30 }
 0x5f0   : > { %v1198_v28 = vsel %vm1197_vm4, %v1195_v24, %v1161_v16 }
 0x602   : > { %v1185_v31 = vpop.permute.xlu2 %1184 }
 0x603   : > { %v1169_v27 = vpop.permute.xlu1 %1168 }
 0x604   : > { %v1201_v60 = vsel %vm1200_vm5, %v1198_v28, %v1169_v27 }
 0x60a   : > { %v1187_v42 = vpop.permute.xlu2 %1186 }
 0x60c   : > { %v1177_v29 = vpop.permute.xlu0 %1176 }
 0x60d   : > { %v1204_v35 = vsel %vm1203_vm6, %v1201_v60, %v1177_v29 }
 0x60e   : > { %v1207_v32 = vsel %vm1206_vm7, %v1204_v35, %v1185_v31 }
 0x60f   : > { %1437 = vmatmul.msk.f32.vlgmr.msra.gmra.mxu0 %vm317_vm0, %v1207_v32 }
 0x614   : > { %v1139_v33 = vpop.permute.xlu0 %1138 }
 0x615   : > { %v1191_v36 = vsel %vm376_vm1, %v2169_v38, %v1139_v33  ;;  %v1580_v38 = vld [vmem:[%s2383_s4] ss:$0 sm:$0xff] }
 0x616   : > { %v1193_v37 = vsel %vm408_vm2, %v1191_v36, %v1147_v20 }
 0x61c   : > { %v1155_v34 = vpop.permute.xlu0 %1154 }
 0x61d   : > { %v1196_v39 = vsel %vm1194_vm3, %v1193_v37, %v1155_v34 }
 0x61e   : > { %v1199_v43 = vsel %vm1197_vm4, %v1196_v39, %v1163_v0 }
 0x624   : > { %v1171_v41 = vpop.permute.xlu0 %1170 }
 0x625   : > { %v1202_v45 = vsel %vm1200_vm5, %v1199_v43, %v1171_v41 }
 0x643   : > { %v1179_v40 = vpop.permute.xlu1 %1178 }
 0x644   : > { %v1205_v46 = vsel %vm1203_vm6, %v1202_v45, %v1179_v40 }
 0x645   : > { %v1208_v47 = vsel %vm1206_vm7, %v1205_v46, %v1187_v42 }
 0x646   : > { %1438 = vmatmul.msk.f32.gmra.mxu0 %vm317_vm0, %v1208_v47 }
 0x68c   : > { %v1244_v48 = vpop.f32.mrf.mxu0 }
 0x68d   : > { %v1245_v49 = vadd.f32 %v1580_v38, %v1244_v48 }
 0x68f   : > { %1250 = vst.msk [vmem:[%s292_s16] sm:$0xff] %vm317_vm0, %v1245_v49 }
 0x6c3   : > { %v1247_v51 = vpop.f32.mrf.mxu0 }
 0x6c4   : > { %v1248_v25 = vadd.f32 %v1580_v38, %v1247_v51 }
 0x6c6   : > { %1251 = vst.msk [vmem:[%s292_s16 + $0x8] sm:$0xff] %vm317_vm0, %v1248_v25 }
 0x6c7   : > { %1792 = shalt.err (!%p1789_p10)
}
 0x6c8   : > { %s1863_s17 = smov 128  }
 0x6c9   : > { %1462 = dma.vmem_to_hbm [thread:$0]  (%p1979_p3), %s1266_s14, 256, %s1268_s15, %s1253_s7, %s1863_s17, %s1863_s17, %s1856_s12  }
 0x6ca PF: > { %s1282_s16 = sand.u32 1, %s1827_s18   ;;  %p2393_p12 = scmp.ge.s32.totalorder %s1839_s21, 2 }
 0x6cb   : > { %s1283_s23 = scalar_lea.sflag [#allocation4], %s1282_s16 }
 0x6cc   : > { %p1479_p13 = pnand %p2393_p12, %p1929_p6 }
 0x6ce   : > { %p1480_p0 = pneg %p1479_p13 }
 0x6d0   : > { %1822 = dma.done.wait (%p1480_p0), %s1283_s23, 256  }
 0x6d1   : > { %1824 = vsyncadd (%p1480_p0), %s1283_s23, 4294967040  ;;  %p20_p5 = scmp.ge.s32.totalorder %s1966_s30, 4   ;;  %s2394_s18 = smov %s1831_s19 }
 0x6d2   : > { %s2395_s19 = smov %s1835_s20  ;;  %s2396_s20 = smov %s1975_s9 }
 0x6d3   : > { %s2397_s21 = smov %s1966_s30  ;;  %22 = sbr.rel (!%p20_p5) target bundleno = 7 (0x7), region = 97 }
 0x6d8   :  { %1289 = vsyncpa [#allocation3], 1 }
 0x6d9   :  { %1291 = vsyncpa [#allocation3 + $0x1], 1 }
 0x6da   :  { %1292 = vsyncpa [#allocation6], 1 }
 0x6db   :  { %1293 = vsyncpa [#allocation9], 1 }
 0x6dc   :  { %1294 = vsyncpa [#allocation4], 1 }
 0x6dd   :  { %1296 = vsyncpa [#allocation4 + $0x1], 1 }

</bundles_post_ra>
